<compile_context>
chip_gen: v7x
topology: tpu7x:2x2x1
jax: 0.10.0
libtpu: 0.0.40
codegen_flags: <defaults>
</compile_context>

<pallas_src>
import functools

import jax
import jax.numpy as jnp
from jax import lax
from jax.experimental import pallas as pl
from jax.experimental.pallas import tpu as pltpu


def _lane_pad(c):
    """VMEM pads the lane (last) axis to a multiple of 128."""
    return ((c + 127) // 128) * 128


def _vmem_defaults():
    """Generation-aware (input budget, scoped vmem limit) in bytes."""
    try:
        cap = int(pltpu.get_tpu_info().vmem_capacity_bytes)
    except Exception:
        cap = 64 * 1024 * 1024  # conservative: v7x has 64 MiB per TensorCore
    # ~3/8 of physical for the double-buffered input budget, ~3/4 for the
    # Mosaic scoped limit: 48 / 96 MiB on v5e/v6e (128 MiB), 24 / 48 MiB on v7x.
    return (cap * 3) // 8, (cap * 3) // 4


def _pick_row_tile(n, c, logits_itemsize, labels_bytes_per_row, budget_bytes):
    """Largest multiple-of-8 row tile whose double-buffered inputs fit."""
    per_row = _lane_pad(c) * logits_itemsize + labels_bytes_per_row
    max_rows = max(8, budget_bytes // (2 * per_row))  # 2 pipeline buffers
    rt = (max_rows // 8) * 8
    n_rounded = max(8, ((n + 7) // 8) * 8)            # don't exceed the problem
    return max(8, min(rt, n_rounded))


def _focal_loss_kernel(logits_ref, labels_ref, out_ref, *, alpha, gamma,
                       n_total, row_tile, num_classes, labels_are_indices,
                       labels_sum_to_one):
    i = pl.program_id(0)

    x = logits_ref[...].astype(jnp.float32)                        # (TN, C)

    # Stable log-softmax CE without materializing softmax:
    #   ce = -(y * log_softmax(x)).sum(-1)
    #      = sum(y) * log(sum(exp(x - m))) - sum(y * (x - m))
    m = jnp.max(x, axis=-1, keepdims=True)
    xm = x - m
    log_s = jnp.log(jnp.sum(jnp.exp(xm), axis=-1, keepdims=True))  # (TN, 1)

    if labels_are_indices:
        lbl = labels_ref[...]                                      # (TN, 1) i32
        cls = lax.broadcasted_iota(jnp.int32, (row_tile, num_classes), 1)
        xm_at_label = jnp.sum(jnp.where(cls == lbl, xm, 0.0),
                              axis=-1, keepdims=True)
        ce = log_s - xm_at_label                                   # sum(y) == 1
    else:
        y = labels_ref[...].astype(jnp.float32)                    # (TN, C)
        sum_y_xm = jnp.sum(y * xm, axis=-1, keepdims=True)
        if labels_sum_to_one:
            ce = log_s - sum_y_xm
        else:
            ce = jnp.sum(y, axis=-1, keepdims=True) * log_s - sum_y_xm

    pt = jnp.exp(-ce)
    one_minus_pt = jnp.maximum(1.0 - pt, 0.0)   # clamp: pt can round above 1
    if gamma == 2.0:                            # common case: avoid generic pow
        focal = one_minus_pt * one_minus_pt
    elif gamma == 1.0:
        focal = one_minus_pt
    elif gamma == 0.0:
        focal = jnp.ones_like(one_minus_pt)
    else:
        focal = one_minus_pt ** gamma
    loss = alpha * focal * ce                                      # (TN, 1)

    def _store(partial):
        # Fill the whole (1, 8, 128) output tile with the block's partial sum
        # (plain unmasked stores); the wrapper reads element [:, 0, 0].
        out_ref[...] = jnp.full((1, 8, 128), partial, jnp.float32)

    if n_total % row_tile == 0:
        # No tail anywhere: no masking needed on any block.
        _store(jnp.sum(loss))
    else:
        last = pl.num_programs(0) - 1

        @pl.when(i != last)
        def _():
            _store(jnp.sum(loss))

        @pl.when(i == last)
        def _():
            # Only the last block contains padded (undefined) tail rows.
            row_ids = last * row_tile + lax.broadcasted_iota(
                jnp.int32, (row_tile, 1), 0)
            _store(jnp.sum(jnp.where(row_ids < n_total, loss, 0.0)))


def focal_loss(logits, labels, *, alpha=0.25, gamma=2.0, epsilon=1e-9,
               reduction="mean", labels_sum_to_one=False, row_tile=None,
               vmem_budget_bytes=None, vmem_limit_bytes=None):
    """Pallas implementation of FocalLoss.forward.

    logits: (N, C) f32 or bf16.  bf16 is the fast path (half the HBM bytes);
            compute is f32 in-kernel either way.
    labels: dense (N, C) weights (matches the PyTorch module), or an integer
            (N,) / (N, 1) class-index vector — the index fast path halves HBM
            traffic and implies the labels sum to one.
    Returns a scalar for reduction in {"mean", "sum"}.
    NOTE: `epsilon` is unused, matching the reference forward() which never
    applies it inside the log.
    """
    assert reduction in ("mean", "sum")
    assert logits.ndim == 2
    N, C = logits.shape

    labels_are_indices = bool(jnp.issubdtype(labels.dtype, jnp.integer))
    if labels_are_indices:
        if labels.ndim == 1:
            labels = labels.reshape(N, 1)
        assert labels.shape == (N, 1)
        labels = labels.astype(jnp.int32)
        labels_bytes_per_row = 128 * 4  # (row_tile, 1) i32, lane-padded to 128
    else:
        assert labels.shape == (N, C)
        labels_bytes_per_row = _lane_pad(C) * jnp.dtype(labels.dtype).itemsize

    default_budget, default_limit = _vmem_defaults()
    if vmem_budget_bytes is None:
        vmem_budget_bytes = default_budget
    if vmem_limit_bytes is None:
        vmem_limit_bytes = default_limit

    if row_tile is None:
        row_tile = _pick_row_tile(N, C, jnp.dtype(logits.dtype).itemsize,
                                  labels_bytes_per_row, vmem_budget_bytes)
        # Keep >= 2 blocks so the "parallel" grid axis actually spans both
        # TensorCores on v7x (one extra tiny step is harmless on v5e/v6e).
        if pl.cdiv(N, row_tile) == 1 and N > 8:
            row_tile = max(8, (((N + 1) // 2 + 7) // 8) * 8)
    row_tile = int(row_tile)
    num_blocks = int(pl.cdiv(N, row_tile))

    kernel = functools.partial(
        _focal_loss_kernel,
        alpha=float(alpha), gamma=float(gamma),
        n_total=int(N), row_tile=row_tile, num_classes=int(C),
        labels_are_indices=labels_are_indices,
        labels_sum_to_one=bool(labels_sum_to_one),
    )

    if labels_are_indices:
        labels_spec = pl.BlockSpec((row_tile, 1), lambda i: (i, 0))
    else:
        labels_spec = pl.BlockSpec((row_tile, C), lambda i: (i, 0))

    partials = pl.pallas_call(
        kernel,
        out_shape=jax.ShapeDtypeStruct((num_blocks, 8, 128), jnp.float32),
        grid_spec=pltpu.PrefetchScalarGridSpec(
            num_scalar_prefetch=0,
            grid=(num_blocks,),
            in_specs=[
                pl.BlockSpec((row_tile, C), lambda i: (i, 0)),
                labels_spec,
            ],
            out_specs=pl.BlockSpec((1, 8, 128), lambda i: (i, 0, 0)),
        ),
        compiler_params=pltpu.CompilerParams(
            dimension_semantics=("parallel",),   # independent per-block partials
            vmem_limit_bytes=int(vmem_limit_bytes),
        ),
    )(logits, labels)

    total = jnp.sum(partials[:, 0, 0])
    if reduction == "mean":
        return total / jnp.float32(N)
    return total


def _focal_loss_ref(logits, labels, alpha=0.25, gamma=2.0, reduction="mean"):
    p = jax.nn.softmax(logits.astype(jnp.float32), axis=-1)
    ce = -jnp.sum(labels.astype(jnp.float32) * jnp.log(p), axis=-1)
    pt = jnp.exp(-ce)
    loss = alpha * (1.0 - pt) ** gamma * ce
    return loss.mean() if reduction == "mean" else loss.sum()


if __name__ == "__main__":
    key = jax.random.PRNGKey(0)
    k1, k2, k3, k4 = jax.random.split(key, 4)

    # Test 1: dense one-hot labels, mean reduction, auto row tile (exercises
    # the >=2-block split so both v7x TensorCores would be used).
    N, C = 16, 32
    logits = jax.random.normal(k1, (N, C), dtype=jnp.float32)
    label_idx = jax.random.randint(k2, (N,), 0, C)
    labels = jax.nn.one_hot(label_idx, C, dtype=jnp.float32)

    out = focal_loss(logits, labels, alpha=0.25, gamma=2.0, reduction="mean")
    out = jax.block_until_ready(out)
    ref = _focal_loss_ref(logits, labels, alpha=0.25, gamma=2.0,
                          reduction="mean")
    assert jnp.allclose(out, ref, rtol=1e-5, atol=1e-5), (out, ref)

    # Test 2: N not a multiple of row_tile (tail masking on the last block
    # only), multi-block parallel partial sums, sum reduction.
    N2, C2 = 25, 32
    logits2 = jax.random.normal(k3, (N2, C2), dtype=jnp.float32)
    label_idx2 = jax.random.randint(k4, (N2,), 0, C2)
    labels2 = jax.nn.one_hot(label_idx2, C2, dtype=jnp.float32)

    out2 = focal_loss(logits2, labels2, alpha=0.25, gamma=2.0,
                      reduction="sum", row_tile=8)
    out2 = jax.block_until_ready(out2)
    ref2 = _focal_loss_ref(logits2, labels2, alpha=0.25, gamma=2.0,
                           reduction="sum")
    assert jnp.allclose(out2, ref2, rtol=1e-5, atol=1e-5), (out2, ref2)

    # Test 3: class-index fast path (half the HBM traffic) matches dense path.
    out3 = focal_loss(logits, label_idx.astype(jnp.int32), reduction="mean")
    out3 = jax.block_until_ready(out3)
    assert jnp.allclose(out3, ref, rtol=1e-5, atol=1e-5), (out3, ref)

    out4 = focal_loss(logits2, label_idx2.astype(jnp.int32), reduction="sum",
                      row_tile=8)
    out4 = jax.block_until_ready(out4)
    assert jnp.allclose(out4, ref2, rtol=1e-5, atol=1e-5), (out4, ref2)

    # Test 4: bf16 inputs consumed natively (no wrapper-side upcast), with the
    # labels_sum_to_one shortcut for normalized (one-hot) labels.
    logits_bf = logits.astype(jnp.bfloat16)
    labels_bf = labels.astype(jnp.bfloat16)
    out5 = focal_loss(logits_bf, labels_bf, reduction="mean",
                      labels_sum_to_one=True)
    out5 = jax.block_until_ready(out5)
    ref5 = _focal_loss_ref(logits_bf, labels_bf, reduction="mean")
    assert jnp.allclose(out5, ref5, rtol=1e-4, atol=1e-4), (out5, ref5)

    print("KERNEL_OK")
</pallas_src>

<mosaic_0001>
module attributes {stable_mosaic.version = 11 : i64} {
  func.func @_focal_loss_kernel(%arg0: i32, %arg1: memref<8x32xf32, #tpu.memory_space<vmem>>, %arg2: memref<8x32xf32, #tpu.memory_space<vmem>>, %arg3: memref<1x8x128xf32, #tpu.memory_space<vmem>>) attributes {dimension_semantics = [#tpu.dimension_semantics<parallel>], iteration_bounds = array<i64: 2>, scalar_prefetch = 0 : i64, scratch_operands = 0 : i64, tpu.core_type = #tpu.core_type<tc>, window_params = [{transform_indices = @transform_0, window_bounds = array<i64: 8, 32>}, {transform_indices = @transform_1, window_bounds = array<i64: 8, 32>}, {transform_indices = @transform_2, window_bounds = array<i64: 1, 8, 128>}]} {
    %c0 = arith.constant 0 : index
    %c0_0 = arith.constant 0 : index
    %0 = vector.load %arg1[%c0, %c0_0] : memref<8x32xf32, #tpu.memory_space<vmem>>, vector<8x32xf32>
    %cst = arith.constant dense<0xFF800000> : vector<8xf32>
    %1 = vector.multi_reduction <maximumf>, %0, %cst [1] : vector<8x32xf32> to vector<8xf32>
    %2 = vector.shape_cast %1 : vector<8xf32> to vector<8x1xf32>
    %3 = vector.broadcast %2 : vector<8x1xf32> to vector<8x32xf32>
    %4 = arith.subf %0, %3 : vector<8x32xf32>
    %5 = math.exp %4 : vector<8x32xf32>
    %cst_1 = arith.constant dense<0.000000e+00> : vector<8xf32>
    %6 = vector.multi_reduction <add>, %5, %cst_1 [1] : vector<8x32xf32> to vector<8xf32>
    %7 = vector.shape_cast %6 : vector<8xf32> to vector<8x1xf32>
    %8 = math.log %7 : vector<8x1xf32>
    %c0_2 = arith.constant 0 : index
    %c0_3 = arith.constant 0 : index
    %9 = vector.load %arg2[%c0_2, %c0_3] : memref<8x32xf32, #tpu.memory_space<vmem>>, vector<8x32xf32>
    %10 = arith.mulf %9, %4 : vector<8x32xf32>
    %cst_4 = arith.constant dense<0.000000e+00> : vector<8xf32>
    %11 = vector.multi_reduction <add>, %10, %cst_4 [1] : vector<8x32xf32> to vector<8xf32>
    %12 = vector.shape_cast %11 : vector<8xf32> to vector<8x1xf32>
    %cst_5 = arith.constant dense<0.000000e+00> : vector<8xf32>
    %13 = vector.multi_reduction <add>, %9, %cst_5 [1] : vector<8x32xf32> to vector<8xf32>
    %14 = vector.shape_cast %13 : vector<8xf32> to vector<8x1xf32>
    %15 = arith.mulf %14, %8 : vector<8x1xf32>
    %16 = arith.subf %15, %12 : vector<8x1xf32>
    %cst_6 = arith.constant 0.000000e+00 : f32
    %17 = vector.broadcast %cst_6 : f32 to vector<8x1xf32>
    %18 = arith.subf %17, %16 : vector<8x1xf32>
    %19 = math.exp %18 : vector<8x1xf32>
    %cst_7 = arith.constant 1.000000e+00 : f32
    %20 = vector.broadcast %cst_7 : f32 to vector<8x1xf32>
    %21 = arith.subf %20, %19 : vector<8x1xf32>
    %cst_8 = arith.constant 0.000000e+00 : f32
    %22 = vector.broadcast %cst_8 : f32 to vector<8x1xf32>
    %23 = arith.maximumf %21, %22 : vector<8x1xf32>
    %24 = arith.mulf %23, %23 : vector<8x1xf32>
    %cst_9 = arith.constant 2.500000e-01 : f32
    %25 = vector.broadcast %cst_9 : f32 to vector<8x1xf32>
    %26 = arith.mulf %25, %24 : vector<8x1xf32>
    %27 = arith.mulf %26, %16 : vector<8x1xf32>
    %28 = vector.shape_cast %27 : vector<8x1xf32> to vector<1x8x1xf32>
    %cst_10 = arith.constant dense<0.000000e+00> : vector<1xf32>
    %29 = vector.multi_reduction <add>, %28, %cst_10 [1, 2] : vector<1x8x1xf32> to vector<1xf32>
    %30 = vector.shape_cast %29 : vector<1xf32> to vector<1x1x1xf32>
    %31 = vector.extract %30[0, 0, 0] : f32 from vector<1x1x1xf32>
    %32 = vector.broadcast %31 : f32 to vector<1x8x128xf32>
    %c0_11 = arith.constant 0 : index
    %c0_12 = arith.constant 0 : index
    %c0_13 = arith.constant 0 : index
    %33 = vector.load %arg3[%c0_11, %c0_12, %c0_13] : memref<1x8x128xf32, #tpu.memory_space<vmem>>, vector<1x8x128xf32>
    tpu.vector_store %arg3[%c0_11, %c0_12, %c0_13], %32 {strides = array<i32>} : memref<1x8x128xf32, #tpu.memory_space<vmem>>, vector<1x8x128xf32>,
    return
  }
  func.func @transform_0(%arg0: i32) -> (i32, i32) {
    %c0_i32 = arith.constant 0 : i32
    %c0_i32_0 = arith.constant 0 : i32
    return %arg0, %c0_i32 : i32, i32
  }
  func.func @transform_1(%arg0: i32) -> (i32, i32) {
    %c0_i32 = arith.constant 0 : i32
    %c0_i32_0 = arith.constant 0 : i32
    return %arg0, %c0_i32 : i32, i32
  }
  func.func @transform_2(%arg0: i32) -> (i32, i32, i32) {
    %c0_i32 = arith.constant 0 : i32
    %c0_i32_0 = arith.constant 0 : i32
    %c0_i32_1 = arith.constant 0 : i32
    return %arg0, %c0_i32, %c0_i32_0 : i32, i32, i32
  }
}

</mosaic_0001>

<bundles_post_ra>
// kernel: tpu_custom_call.1
= control target key start
LH: loop header
LB: loop body
LE: loop exit
PB: predicated region body
PF: predicated region fallthrough
CT: control target
= control target key end

     0   :  { %7 = vsyncpa [#allocation3], 0  ;;  %s785_s0 = inlined_call_operand.hbm [shape: f32[16,32], index: 0, kind: input, shape index: {}]   ;;  %s786_s1 = inlined_call_operand.hbm [shape: f32[16,32], index: 1, kind: input, shape index: {}]   ;;  %s787_s2 = inlined_call_operand.hbm [shape: f32[2,8,128], index: 2, kind: output, shape index: {}]  }
   0x1   :  { %9 = vsyncpa [#allocation3 + $0x1], 0 }
   0x2   :  { %10 = vsyncpa [#allocation6], 0 }
   0x3   :  { %12 = vsyncpa [#allocation6 + $0x1], 0 }
   0x4   :  { %13 = vsyncpa [#allocation4], 0 }
   0x5   :  { %15 = vsyncpa [#allocation4 + $0x1], 0  ;;  %s571_s9 = smov 0   ;;  %s573_s10 = smov 0  }
   0x6   :  { %s575_s11 = smov 0   ;;  %s577_s12 = smov 0  }
   0x7 LB: > { %s592_s13 = sadd.s32 4294967295, %s551_s12   ;;  %s347_s14 = sadd.s32 4294967294, %s551_s12   ;;  %s551_s12 = sphi %s577_s12, %s806_s12   ;;  %s547_s11 = sphi %s575_s11, %s805_s11   ;;  %s543_s10 = sphi %s573_s10, %s804_s10   ;;  %s539_s9 = sphi %s571_s9, %s803_s9  }
   0x8   : > { %s596_s15 = sadd.s32 1, %s551_s12   ;;  %s28_s16 = sadd.s32 1, %s547_s11 }
   0x9   : > { %s25_s17 = ssub.s32 %s551_s12, %s596_s15  ;;  %p35_p0 = scmp.ne.s32.totalorder %s547_s11, %s543_s10 }
   0xa   : > { %p26_p1 = scmp.eq.s32.totalorder %s25_s17, 0  ;;  %p36_p2 = scmp.eq.s32.totalorder %s551_s12, 0 }
   0xb   : > { %p41_p3 = scmp.ne.s32.totalorder %s543_s10, %s539_s9  ;;  %p42_p4 = scmp.eq.s32.totalorder %s592_s13, 0 }
   0xc   : > { %s608_s18 = scalar_select %p26_p1, %s547_s11, %s28_s16  }
   0xd   : > { %p610_p5 = por %p36_p2, %p35_p0  ;;  %p614_p6 = por %p42_p4, %p41_p3 }
   0xe   : > { %p91_p7 = scmp.eq.s32.totalorder %s592_s13, 1  ;;  %p97_p8 = scmp.eq.s32.totalorder %s347_s14, 1 }
   0xf   : > { %s791_s20 = scalar_select %p614_p6, 1, 0 }
  0x10   : > { %p381_p10 = scmp.lt.s32.totalorder %s551_s12, 2  ;;  %p621_p11 = por %p91_p7, %p35_p0 }
  0x11   : > { %p625_p12 = por %p97_p8, %p41_p3  ;;  %s630_s23 = sand.u32 1, %s547_s11  }
  0x12   : > { %s792_s21 = scalar_select %p621_p11, 1, 0 }
  0x13   : > { %s793_s22 = scalar_select %p625_p12, 1, 0 }
  0x14   : > { %s351_s24 = sshll.u32 %s551_s12, 7  ;;  %s350_s25 = sshll.u32 %s630_s23, 3 }
  0x15   : > { %s639_s28 = scalar_lea.hbm %s785_s0, %s351_s24  ;;  %s121_s29 = scalar_lea.vmem [#allocation2], %s350_s25 }
  0x16   : > { %s128_s30 = sshll.u32 %s121_s29, 4  ;;  %p645_p13 = pnand %p381_p10, %p610_p5  ;;  %s649_s30 = int_to_ptr.vmem [resolvable:$true] %s128_s30 }
  0x17   : > { %s118_s4 = scalar_lea.sflag [#allocation3], %s630_s23  ;;  %s421_s5 = scalar_lea.hbm %s639_s28, 128 }
  0x18   : > { %p422_p2 = scmp.ne.s32.totalorder %s639_s28, %s421_s5  ;;  %p423_p3 = pneg %p645_p13 }
  0x19   : > { %s426_s8 = scalar_lea.hbm %s785_s0, 256  ;;  %p427_p5 = scmp.lt.u32.totalorder %s639_s28, %s785_s0 }
  0x1a   : > { %p424_p4 = pnand %p423_p3, %p422_p2  ;;  %p428_p8 = scmp.lt.u32.totalorder %s426_s8, %s421_s5 }
  0x1b   : > { %p430_p9 = scmp.lt.u32.totalorder %s421_s5, %s639_s28 }
  0x1c   : > { %p425_p7 = pneg %p424_p4  ;;  %p429_p10 = por %p428_p8, %p427_p5 }
  0x1e   : > { %p431_p0 = por %p430_p9, %p429_p10 }
  0x20   : > { %p432_p1 = pnand %p431_p0, %p425_p7 }
  0x22   : > { %435 = shalt.err (!%p432_p1)
}
  0x23   : > { %s436_s17 = scalar_lea.vmem %s649_s30, 128  ;;  %s553_s19 = smov [#allocation2]  }
  0x24   : > { %p437_p2 = scmp.ne.s32.totalorder %s649_s30, %s436_s17  ;;  %s441_s26 = sshll.u32 %s553_s19, 4  ;;  %s442_s26 = int_to_ptr.vmem [resolvable:$false] %s441_s26 }
  0x25   : > { %s443_s27 = scalar_lea.vmem %s442_s26, 256  ;;  %p444_p11 = scmp.lt.s32.totalorder %s649_s30, %s442_s26 }
  0x26   : > { %p439_p4 = pnand %p437_p2, %p423_p3  ;;  %p445_p5 = scmp.lt.s32.totalorder %s443_s27, %s436_s17 }
  0x28   : > { %p440_p12 = pneg %p439_p4  ;;  %p446_p8 = por %p445_p5, %p444_p11 }
  0x2a   : > { %p447_p9 = pnand %p446_p8, %p440_p12 }
  0x2c   : > { %450 = shalt.err (!%p447_p9)
}
  0x2d   : > { %373 = dma.hbm_to_vmem [thread:$0]  (!%p645_p13), %s639_s28, 128, %s649_s30, %s118_s4  }
  0x2e   : > { %p795_p0 = scmp.lt.s32.totalorder %s551_s12, 3  ;;  %p796_p1 = scmp.ge.s32.totalorder %s551_s12, 1 }
  0x2f   : > { %s692_s7 = scalar_lea.hbm %s786_s1, %s351_s24  ;;  %s139_s8 = scalar_lea.vmem [#allocation5], %s350_s25 }
  0x30   : > { %p683_p7 = pnand %p796_p1, %p795_p0  ;;  %s146_s14 = sshll.u32 %s139_s8, 4  ;;  %s147_s14 = int_to_ptr.vmem [resolvable:$true] %s146_s14 }
  0x31   : > { %s136_s28 = scalar_lea.sflag [#allocation6], %s630_s23  ;;  %s451_s30 = scalar_lea.hbm %s692_s7, 128 }
  0x32   : > { %s797_s29 = scalar_select %p683_p7, 1, 0 }
  0x33   : > { %p452_p11 = scmp.ne.s32.totalorder %s692_s7, %s451_s30  ;;  %s456_s24 = scalar_lea.hbm %s786_s1, 256 }
  0x34   : > { %p457_p2 = scmp.lt.u32.totalorder %s692_s7, %s786_s1  ;;  %p458_p4 = scmp.lt.u32.totalorder %s456_s24, %s451_s30 }
  0x35   : > { %p454_p12 = pnand %p452_p11, %p423_p3  ;;  %p460_p8 = scmp.lt.u32.totalorder %s451_s30, %s692_s7 }
  0x36   : > { %p459_p5 = por %p458_p4, %p457_p2 }
  0x37   : > { %p455_p10 = pneg %p454_p12 }
  0x38   : > { %p461_p9 = por %p460_p8, %p459_p5 }
  0x3a   : > { %p462_p0 = pnand %p461_p9, %p455_p10 }
  0x3c   : > { %465 = shalt.err (!%p462_p0)
}
  0x3d   : > { %s466_s23 = scalar_lea.vmem %s147_s14, 128  ;;  %s554_s25 = smov [#allocation5]  }
  0x3e   : > { %p467_p1 = scmp.ne.s32.totalorder %s147_s14, %s466_s23  ;;  %s471_s26 = sshll.u32 %s554_s25, 4  ;;  %s472_s26 = int_to_ptr.vmem [resolvable:$false] %s471_s26 }
  0x3f   : > { %s473_s27 = scalar_lea.vmem %s472_s26, 256  ;;  %p474_p6 = scmp.lt.s32.totalorder %s147_s14, %s472_s26 }
  0x40   : > { %p469_p11 = pnand %p467_p1, %p423_p3  ;;  %p475_p7 = scmp.lt.s32.totalorder %s473_s27, %s466_s23 }
  0x42   : > { %p470_p12 = pneg %p469_p11  ;;  %p476_p2 = por %p475_p7, %p474_p6 }
  0x44   : > { %p477_p4 = pnand %p476_p2, %p470_p12 }
  0x46   : > { %480 = shalt.err (!%p477_p4)
}
  0x47   : > { %376 = dma.hbm_to_vmem [thread:$0]  (!%p645_p13), %s692_s7, 128, %s147_s14, %s136_s28  }
  0x48   : > { %p798_p10 = scmp.ne.s32.totalorder %s797_s29, 0 }
  0x49   : > { %s719_s5 = sand.u32 (!%p798_p10), 1, %s543_s10   ;;  %p799_p6 = scmp.ne.s32.totalorder (!%p798_p10), %s791_s20, 0 }
  0x4a   : > { %155 = sbr.rel (%p798_p10) target bundleno = 648 (0x288), region = 28  ;;  %s722_s6 = sshll.u32 (!%p798_p10), %s719_s5, 3 }
  0x4b   : > { %s158_s8 = scalar_lea.sflag (!%p798_p10), [#allocation3], %s719_s5  ;;  %s161_s30 = scalar_lea.vmem (!%p798_p10), [#allocation2], %s722_s6 }
  0x51   : > { %526 = dma.done.wait (%p799_p6), %s158_s8, 128  }
  0x52   : > { %528 = vsyncadd (%p799_p6), %s158_s8, 4294967168  ;;  %s167_s3 = scalar_lea.sflag [#allocation6], %s719_s5  ;;  %s170_s29 = scalar_lea.vmem [#allocation5], %s722_s6 }
  0x53   : > { %530 = dma.done.wait (%p799_p6), %s167_s3, 128  }
  0x54   : > { %532 = vsyncadd (%p799_p6), %s167_s3, 4294967168  ;;  %vm197_vm0 = vcmask 261120   ;;  %v196_v0 = vld [vmem:[%s161_s30] sm:$0xff]  ;;  %v209_v2 = vld [vmem:[%s170_s29] sm:$0xff]  ;;  %vm227_vm1 = vcmask 7168   ;;  %s195_s20 = scalar_lea.vmem [#allocation7], %s722_s6 }
  0x55   : > { %v198_v1 = vsel %vm197_vm0, %v196_v0, -inf  ;;  %v214_v3 = vsel %vm197_vm0, %v209_v2, 0.0  ;;  %s254_s7 = sshll.u32 %s195_s20, 4  ;;  %s359_s14 = sshll.u32 %s592_s13, 7  ;;  %s738_s7 = int_to_ptr.vmem [resolvable:$true] %s254_s7 }
  0x56   : > { %199 = vmax.xlane.f32.xlu0 %v198_v1  ;;  %215 = vadd.xlane.f32.xlu1 %v214_v3  ;;  %s743_s24 = scalar_lea.hbm %s787_s2, %s359_s14  ;;  %s241_s17 = scalar_lea.sflag [#allocation4], %s719_s5 }
  0x57   : > { %s481_s19 = scalar_lea.vmem %s738_s7, 128  ;;  %p800_p3 = scmp.ne.s32.totalorder %s792_s21, 0 }
  0x58   : > { %p482_p13 = scmp.ne.s32.totalorder %s738_s7, %s481_s19  ;;  %s555_s13 = smov [#allocation7]  }
  0x59   : > { %s485_s23 = sshll.u32 %s555_s13, 4  ;;  %s486_s23 = int_to_ptr.vmem [resolvable:$false] %s485_s23 }
  0x5a   : > { %p483_p7 = pnand %p482_p13, %p800_p3  ;;  %s487_s25 = scalar_lea.vmem %s486_s23, 256 }
  0x5b   : > { %p488_p8 = scmp.lt.s32.totalorder %s738_s7, %s486_s23  ;;  %p489_p9 = scmp.lt.s32.totalorder %s487_s25, %s481_s19 }
  0x5c   : > { %p484_p5 = pneg %p483_p7 }
  0x5d   : > { %p490_p0 = por %p489_p9, %p488_p8 }
  0x5f   : > { %p491_p1 = pnand %p490_p0, %p484_p5 }
  0xe3   : > { %v200_v4 = vpop.xlane.xlu0 %199  ;;  %v216_v12 = vpop.xlane.xlu1 %215 }
  0xe4   : > { %v201_v5 = vsub.f32 %v196_v0, %v200_v4 }
  0xe6   : > { %v202_v6 = vmul.f32 1.442695, %v201_v5  ;;  %v210_v7 = vmul.f32 %v209_v2, %v201_v5 }
  0xe8   : > { %415 = vpow2.f32 %v202_v6  ;;  %v211_v8 = vsel %vm197_vm0, %v210_v7, 0.0 }
  0xe9   : > { %212 = vadd.xlane.f32.xlu1 %v211_v8 }
  0xf2   : > { %v416_v9 = vpop.eup %415 }
  0xf3   : > { %v204_v10 = vsel %vm197_vm0, %v416_v9, 0.0 }
  0xf4   : > { %205 = vadd.xlane.f32.xlu0 %v204_v10 }
 0x176   : > { %v213_v16 = vpop.xlane.xlu1 %212 }
 0x181   : > { %v206_v11 = vpop.xlane.xlu0 %205 }
 0x182   : > { %417 = vlog2.f32 %v206_v11 }
 0x18c   : > { %v418_v13 = vpop.eup %417 }
 0x18d   : > { %v208_v14 = vmul.f32 0.6931472, %v418_v13 }
 0x18f   : > { %v217_v15 = vmul.f32 %v216_v12, %v208_v14 }
 0x191   : > { %v218_v17 = vsub.f32 %v217_v15, %v213_v16 }
 0x193   : > { %v219_v18 = vsub.f32 0.0, %v218_v17 }
 0x195   : > { %v220_v19 = vmul.f32 1.442695, %v219_v18 }
 0x197   : > { %419 = vpow2.f32 %v220_v19 }
 0x1a1   : > { %v420_v20 = vpop.eup %419 }
 0x1a2   : > { %v222_v21 = vsub.f32 1.0, %v420_v20 }
 0x1a4   : > { %v223_v22 = vmax.f32 %v222_v21, 0.0 }
 0x1a6   : > { %v224_v23 = vmul.f32 %v223_v22, %v223_v22 }
 0x1a8   : > { %v225_v24 = vmul.f32 0.25, %v224_v23 }
 0x1aa   : > { %v226_v25 = vmul.f32 %v225_v24, %v218_v17 }
 0x1ac   : > { %v228_v26 = vsel %vm227_vm1, %v226_v25, 0.0 }
 0x1ad   : > { %229 = vadd.xlane.f32.xlu0 %v228_v26 }
 0x23a   : > { %v230_v27 = vpop.xlane.xlu0 %229 }
 0x23b   : > { %v231_v28 = vrot.slane %v230_v27, 4 }
 0x23d   : > { %v232_v29 = vadd.f32 %v231_v28, %v230_v27 }
 0x23f   : > { %v233_v30 = vrot.slane %v232_v29, 2 }
 0x241   : > { %v234_v31 = vadd.f32 %v233_v30, %v232_v29 }
 0x243   : > { %v235_v32 = vrot.slane %v234_v31, 1 }
 0x245   : > { %v236_v33 = vadd.f32 %v235_v32, %v234_v31 }
 0x247   : > { %362 = vpush %v236_v33 }
 0x278   : > { %s363_s28 = spop %362 }
 0x279   : > { %v238_v34 = vstv %s363_s28 }
 0x27a   : > { %239 = vst [vmem:[%s195_s20] sm:$0xff] %v238_v34 }
 0x27b   : > { %494 = shalt.err (!%p491_p1)
}
 0x27c   : > { %s495_s26 = scalar_lea.hbm %s743_s24, 128  ;;  %s499_s6 = scalar_lea.hbm %s787_s2, 256 }
 0x27d   : > { %p496_p11 = scmp.ne.s32.totalorder %s743_s24, %s495_s26  ;;  %p500_p4 = scmp.lt.u32.totalorder %s743_s24, %s787_s2 }
 0x27e   : > { %p501_p10 = scmp.lt.u32.totalorder %s499_s6, %s495_s26  ;;  %p503_p13 = scmp.lt.u32.totalorder %s495_s26, %s743_s24 }
 0x27f   : > { %p497_p12 = pnand %p496_p11, %p800_p3 }
 0x280   : > { %p502_p6 = por %p501_p10, %p500_p4 }
 0x281   : > { %p498_p2 = pneg %p497_p12 }
 0x282   : > { %p504_p7 = por %p503_p13, %p502_p6 }
 0x284   : > { %p505_p5 = pnand %p504_p7, %p498_p2 }
 0x286   : > { %508 = shalt.err (!%p505_p5)
}
 0x287   : > { %368 = dma.vmem_to_hbm [thread:$0]  (%p800_p3), %s738_s7, 128, %s743_s24, %s241_s17  }
 0x288 PF: > { %s266_s3 = sand.u32 1, %s539_s9   ;;  %p801_p8 = scmp.ne.s32.totalorder %s793_s22, 0 }
 0x289   : > { %p802_p9 = scmp.ge.s32.totalorder %s551_s12, 2  ;;  %s267_s29 = scalar_lea.sflag [#allocation4], %s266_s3 }
 0x28b   : > { %p378_p0 = pnand %p802_p9, %p801_p8 }
 0x28d   : > { %534 = dma.done.wait (!%p378_p0), %s267_s29, 128  }
 0x28e   : > { %536 = vsyncadd (!%p378_p0), %s267_s29, 4294967168  ;;  %p18_p1 = scmp.ge.s32.totalorder %s596_s15, 4   ;;  %s803_s9 = smov %s543_s10 }
 0x28f   : > { %s804_s10 = smov %s547_s11  ;;  %s805_s11 = smov %s608_s18 }
 0x290   : > { %s806_s12 = smov %s596_s15  ;;  %20 = sbr.rel (!%p18_p1) target bundleno = 7 (0x7), region = 86 }
 0x297   :  { %272 = vsyncpa [#allocation3], 1 }
 0x298   :  { %274 = vsyncpa [#allocation3 + $0x1], 1 }
 0x299   :  { %275 = vsyncpa [#allocation6], 1 }
 0x29a   :  { %277 = vsyncpa [#allocation6 + $0x1], 1 }
 0x29b   :  { %278 = vsyncpa [#allocation4], 1 }
 0x29c   :  { %280 = vsyncpa [#allocation4 + $0x1], 1 }

</bundles_post_ra>
